<compile_context>
chip_gen: v7x
topology: tpu7x:2x2x1
jax: 0.10.0
libtpu: 0.0.40
codegen_flags: <defaults>
</compile_context>

<pallas_src>
import math

import jax
import jax.numpy as jnp
from jax.experimental import pallas as pl
from jax.experimental.pallas import tpu as pltpu


def _copy_kernel(x_ref, o_ref):
    # Lane-dense tile copy; the (free) reshape already happened in the wrapper,
    # so no in-kernel .reshape() / relayout is needed.
    o_ref[...] = x_ref[...]


def _resolve_shape(shape, total):
    """Torch-style view shape resolution with proper error checking."""
    shape = list(shape)
    if shape.count(-1) > 1:
        raise ValueError("only one dimension can be inferred (-1)")
    if -1 in shape:
        known = math.prod(s for s in shape if s != -1)
        if known == 0 or total % known != 0:
            raise ValueError(f"cannot view tensor of size {total} as {tuple(shape)}")
        shape[shape.index(-1)] = total // known
    shape = tuple(shape)
    if math.prod(shape) != total:
        raise ValueError(f"view shape {shape} incompatible with tensor size {total}")
    return shape


# Per-step buffer budget: 2 input + 2 output buffers must fit comfortably under
# the scoped VMEM limit on every generation (v5e default 16 MiB is tightest).
_VMEM_BUFFER_BUDGET = 8 * 1024 * 1024     # bytes for all 4 pipeline buffers
_VMEM_LIMIT_BYTES = 32 * 1024 * 1024      # explicit scoped-VMEM cap (ok on v7x)


def _pallas_copy_2d(x2d):
    """Tiled, lane-dense HBM->HBM copy of a 2-D array via Pallas."""
    rows, cols = x2d.shape
    itemsize = x2d.dtype.itemsize
    bytes_per_row_block = 4 * cols * itemsize     # 2 in bufs + 2 out bufs, per row
    max_tb = max(1, _VMEM_BUFFER_BUDGET // max(1, bytes_per_row_block))

    if rows <= max_tb:
        # Whole array fits: full-extent dims satisfy the (8,128) rule by equality.
        tb = rows
    else:
        # Sub-full row blocks must be a multiple of 8 (sublane quantum).
        tb = min(max_tb, 512)
        tb = max(8, (tb // 8) * 8)

    grid = (pl.cdiv(rows, tb),)

    return pl.pallas_call(
        _copy_kernel,
        out_shape=jax.ShapeDtypeStruct((rows, cols), x2d.dtype),
        grid_spec=pltpu.PrefetchScalarGridSpec(
            num_scalar_prefetch=0,
            grid=grid,
            in_specs=[pl.BlockSpec((tb, cols), lambda i: (i, 0))],
            out_specs=pl.BlockSpec((tb, cols), lambda i: (i, 0)),
        ),
        compiler_params=pltpu.CompilerParams(
            # Independent copy tiles: parallel axis shards across v7x's 2 TCs.
            dimension_semantics=("parallel",),
            vmem_limit_bytes=_VMEM_LIMIT_BYTES,
        ),
        cost_estimate=pl.CostEstimate(
            flops=0,
            transcendentals=0,
            bytes_accessed=2 * rows * cols * itemsize,
        ),
    )(x2d)


def pallas_view(x, shape, *, use_pallas_copy=False):
    """Reshape `x` to `shape` with torch.view semantics.

    Default path is a metadata-only jnp.reshape (the correct, free lowering of
    a contiguous view).  With use_pallas_copy=True the data movement is done by
    a tiled, lane-dense Pallas copy kernel.
    """
    shape = _resolve_shape(shape, x.size)

    if not use_pallas_copy:
        # TODO(synk): torch.view errors on non-contiguous inputs; JAX arrays
        # are always logically contiguous, so that check has no equivalent here.
        return jnp.reshape(x, shape)

    # Mandated-copy path: reshape for free in the wrapper so both Pallas blocks
    # are identical and lane-dense, then copy with a tiled grid.
    if len(shape) >= 2:
        rows, cols = math.prod(shape[:-1]), shape[-1]
    else:
        rows, cols = 1, shape[0]
    x2d = jnp.reshape(x, (rows, cols))
    out2d = _pallas_copy_2d(x2d)
    return jnp.reshape(out2d, shape)


class View:
    """JAX/Pallas counterpart of the PyTorch View module."""

    def __init__(self, shape, *, use_pallas_copy=False):
        self.shape = tuple(shape)
        self.use_pallas_copy = use_pallas_copy

    def __call__(self, x):
        if isinstance(x, tuple):
            return (
                pallas_view(x[0], self.shape, use_pallas_copy=self.use_pallas_copy),
                *x[1:],
            )
        return pallas_view(x, self.shape, use_pallas_copy=self.use_pallas_copy)


if __name__ == "__main__":
    key = jax.random.PRNGKey(0)
    B, C, H, W = 2, 4, 16, 16
    x = jax.random.normal(key, (B, C, H, W), dtype=jnp.float32)
    expected = jnp.reshape(x, (B, C * H * W))

    # 1) Pallas-copy path (exercises the kernel; -1 resolution exercised too).
    view_kernel = View((B, -1), use_pallas_copy=True)
    y = view_kernel(x)
    y = jax.block_until_ready(y)
    assert y.shape == (B, C * H * W)
    assert jnp.array_equal(y, expected)

    # 2) Default (free reshape) path — the recommended production path.
    view_free = View((B, C * H * W))
    z = jax.block_until_ready(view_free(x))
    assert z.shape == (B, C * H * W)
    assert jnp.array_equal(z, expected)

    # 3) Tuple path (first element reshaped via the kernel, rest passed through).
    aux = jnp.arange(8, dtype=jnp.int32)
    y_tup = view_kernel((x, aux))
    jax.block_until_ready(y_tup[0])
    assert y_tup[0].shape == (B, C * H * W)
    assert jnp.array_equal(y_tup[0], expected)
    assert jnp.array_equal(y_tup[1], aux)

    print("KERNEL_OK")
</pallas_src>

<mosaic_0001>
module attributes {stable_mosaic.version = 11 : i64} {
  func.func @_copy_kernel(%arg0: i32, %arg1: memref<2x1024xf32, #tpu.memory_space<vmem>>, %arg2: memref<2x1024xf32, #tpu.memory_space<vmem>>) attributes {dimension_semantics = [#tpu.dimension_semantics<parallel>], iteration_bounds = array<i64: 1>, scalar_prefetch = 0 : i64, scratch_operands = 0 : i64, tpu.core_type = #tpu.core_type<tc>, window_params = [{transform_indices = @transform_0, window_bounds = array<i64: 2, 1024>}, {transform_indices = @transform_1, window_bounds = array<i64: 2, 1024>}]} {
    %c0 = arith.constant 0 : index
    %c0_0 = arith.constant 0 : index
    %0 = vector.load %arg1[%c0, %c0_0] : memref<2x1024xf32, #tpu.memory_space<vmem>>, vector<2x1024xf32>
    %c0_1 = arith.constant 0 : index
    %c0_2 = arith.constant 0 : index
    %1 = vector.load %arg2[%c0_1, %c0_2] : memref<2x1024xf32, #tpu.memory_space<vmem>>, vector<2x1024xf32>
    tpu.vector_store %arg2[%c0_1, %c0_2], %0 {strides = array<i32>} : memref<2x1024xf32, #tpu.memory_space<vmem>>, vector<2x1024xf32>,
    return
  }
  func.func @transform_0(%arg0: i32) -> (i32, i32) {
    %c0_i32 = arith.constant 0 : i32
    %c0_i32_0 = arith.constant 0 : i32
    return %arg0, %c0_i32 : i32, i32
  }
  func.func @transform_1(%arg0: i32) -> (i32, i32) {
    %c0_i32 = arith.constant 0 : i32
    %c0_i32_0 = arith.constant 0 : i32
    return %arg0, %c0_i32 : i32, i32
  }
}

</mosaic_0001>

<bundles_post_ra>
// kernel: tpu_custom_call.1
= control target key start
LH: loop header
LB: loop body
LE: loop exit
PB: predicated region body
PF: predicated region fallthrough
CT: control target
= control target key end

     0   :  { %6 = vsyncpa [#allocation3], 0  ;;  %s126_s0 = inlined_call_operand.hbm [shape: f32[2,1024], index: 0, kind: input, shape index: {}]   ;;  %s127_s1 = inlined_call_operand.hbm [shape: f32[2,1024], index: 1, kind: output, shape index: {}]  }
   0x1   :  { %7 = vsyncpa [#allocation4], 0  ;;  %s90_s6 = smov [#allocation2]   ;;  %s42_s10 = scalar_lea.hbm %s126_s0, 256 }
   0x2   :  { %s14_s7 = sshll.u32 %s90_s6, 4  ;;  %p43_p0 = scmp.ne.s32.totalorder %s126_s0, %s42_s10  ;;  %s15_s7 = int_to_ptr.vmem [resolvable:$true] %s14_s7 }
   0x3   :  { %p46_p1 = scmp.lt.u32.totalorder %s42_s10, %s126_s0 }
   0x5   :  { %p48_p2 = pnand %p46_p1, %p43_p0 }
   0x7   :  { %51 = shalt.err (!%p48_p2)
}
   0x8   :  { %s52_s15 = scalar_lea.vmem %s15_s7, 256  ;;  %p57_p4 = scmp.lt.s32.totalorder %s15_s7, %s15_s7 }
   0x9   :  { %p53_p3 = scmp.ne.s32.totalorder %s15_s7, %s52_s15  ;;  %p58_p5 = scmp.lt.s32.totalorder %s52_s15, %s52_s15 }
   0xb   :  { %p59_p6 = por %p58_p5, %p57_p4 }
   0xd   :  { %p60_p7 = pnand %p59_p6, %p53_p3 }
   0xf   :  { %63 = shalt.err (!%p60_p7)
}
  0x10   :  { %17 = dma.hbm_to_vmem [thread:$0]  %s126_s0, 256, %s15_s7, [#allocation3]  }
  0x11   :  { %86 = dma.done.wait [#allocation3], 256  }
  0x12   :  { %87 = vsyncadd [#allocation3], 4294967040  ;;  %s91_s18 = smov [#allocation5]   ;;  %v21_v0 = vld [vmem:[#allocation2] sm:$0xff]  ;;  %v22_v1 = vld [vmem:[#allocation2 + $0x8] sm:$0xff] }
  0x13   :  { %s31_s19 = sshll.u32 %s91_s18, 4  ;;  %23 = vst [vmem:[#allocation5] sm:$0xff] %v21_v0  ;;  %24 = vst [vmem:[#allocation5 + $0x8] sm:$0xff] %v22_v1  ;;  %s32_s19 = int_to_ptr.vmem [resolvable:$true] %s31_s19 }
  0x14   :  { %s64_s20 = scalar_lea.vmem %s32_s19, 256  ;;  %p69_p9 = scmp.lt.s32.totalorder %s32_s19, %s32_s19 }
  0x15   :  { %p65_p8 = scmp.ne.s32.totalorder %s32_s19, %s64_s20  ;;  %p70_p10 = scmp.lt.s32.totalorder %s64_s20, %s64_s20 }
  0x17   :  { %p71_p11 = por %p70_p10, %p69_p9 }
  0x19   :  { %p72_p12 = pnand %p71_p11, %p65_p8 }
  0x1b   :  { %75 = shalt.err (!%p72_p12)
}
  0x1c   :  { %s76_s0 = scalar_lea.hbm %s127_s1, 256 }
  0x1d   :  { %p77_p13 = scmp.ne.s32.totalorder %s127_s1, %s76_s0  ;;  %p80_p0 = scmp.lt.u32.totalorder %s76_s0, %s127_s1 }
  0x1f   :  { %p82_p1 = pnand %p80_p0, %p77_p13 }
  0x21   :  { %85 = shalt.err (!%p82_p1)
}
  0x22   :  { %34 = dma.vmem_to_hbm [thread:$0]  %s32_s19, 256, %s127_s1, [#allocation4]  }
  0x23   :  { %88 = dma.done.wait [#allocation4], 256  }
  0x24   :  { %89 = vsyncadd [#allocation4], 4294967040 }
  0x25   :  { %38 = vsyncpa [#allocation3], 1 }
  0x26   :  { %39 = vsyncpa [#allocation4], 1 }

</bundles_post_ra>
